<compile_context>
chip_gen: v6e
topology: v6e:2x2x1
jax: 0.10.0
libtpu: 0.0.40
codegen_flags: <defaults>
</compile_context>

<pallas_src>
import math

import jax
import jax.numpy as jnp
from jax.experimental import pallas as pl
from jax.experimental.pallas import tpu as pltpu


def _conv1x2_kernel(x_ref, w_ref, b_ref, o_ref):
    # x_ref: (1, c_in, TS)    activations (bf16), whole W-rows flattened onto lanes
    # w_ref: (c_out, 2*c_in)  both kernel taps preconcatenated along the K axis
    # b_ref: (c_out, 1)       f32 bias
    # o_ref: (1, c_out, TS)
    x = x_ref[0]                                   # (c_in, TS)
    # Tap-1 needs x[:, t + 2] (dilation 2): shift the *activation* left by 2 lanes —
    # strictly cheaper than shifting the (c_out, TS) tap-1 result when c_out > c_in.
    # Wrapped lanes only land on per-row columns {W-2, W-1}, which the wrapper crops.
    x_shift = jnp.roll(x, -2, axis=1)
    xs = jnp.concatenate([x, x_shift], axis=0)     # (2*c_in, TS), K stacked on sublanes
    # Single MXU dot; tap0 + tap1 summed inside the f32 accumulator.
    acc = jnp.dot(w_ref[...], xs, preferred_element_type=jnp.float32)   # (c_out, TS)
    o_ref[0] = (acc + b_ref[...]).astype(o_ref.dtype)


def _vmem_capacity_bytes():
    """Physical VMEM per TensorCore; conservative (v7x, 64 MiB) fallback."""
    try:
        info_fn = getattr(pltpu, "get_tpu_info", None)
        if info_fn is not None:
            info = info_fn()
            for name in ("vmem_capacity_bytes", "vmem_size_bytes", "vmem_bytes"):
                val = getattr(info, name, None)
                if val:
                    return int(val)
    except Exception:
        pass
    return 64 * 1024 * 1024


def _pick_spatial_tile(n, h, w, bytes_per_lane, max_tile_bytes, min_grid_steps=8):
    """Pick rows-per-tile `th` and a padded row count `h_pad` (multiple of `th`).

    Invariants:
      * each tile is `th` whole W-rows -> the dilated tap never crosses a tile,
      * th*W is a multiple of 128 (lane rule) unless th == H (full-extent block),
      * the per-tile footprint th*W*bytes_per_lane is bounded (never falls back to
        an unbounded full-S tile for awkward H — pads by whole rows instead),
      * prefers enough total grid steps (n * h_pad/th >= min_grid_steps) to feed
        v7x's dual TensorCores and the double-buffered DMA pipeline.
    """
    base = 128 // math.gcd(w, 128)                  # smallest th with th*w % 128 == 0
    bytes_per_row = max(1, w * bytes_per_lane)
    cap = max(base, (max_tile_bytes // bytes_per_row) // base * base)

    # Tile height the padded path would use: as large as the cap allows while still
    # leaving ~min_grid_steps grid steps.
    tiles_wanted = max(1, math.ceil(min_grid_steps / n))
    th_pad = max(base, min(cap, math.ceil(h / (tiles_wanted * base)) * base))

    # Exact-divisor candidates (no padding needed).
    cands = {t for t in range(base, min(h, cap) + 1, base) if h % t == 0}
    if h * bytes_per_row <= max_tile_bytes:
        cands.add(h)                                # full-extent block: always legal
    if cands:
        good = [t for t in cands if n * (h // t) >= min_grid_steps]
        th = max(good) if good else min(cands)
        if 2 * th >= th_pad:                        # not pathologically small tiles
            return th, h

    h_padded = math.ceil(h / th_pad) * th_pad       # pad by whole rows (cropped later)
    return th_pad, h_padded


def linear_forward(x, weight, bias, *, compute_dtype=jnp.bfloat16, out_dtype=None):
    """x: (N, c_in, H, W); weight: (c_out, c_in, 1, 2); bias: (c_out,) -> (N, c_out, H, W-2)."""
    n, c_in, h, w = x.shape
    c_out = weight.shape[0]
    if out_dtype is None:
        out_dtype = x.dtype
    w_out = w - 2                                   # kernel (1,2), dilation 2, no pad

    # HBM-resident tensors in bf16 (MXU accumulates in f32).  Bias stays f32.
    x_c = x.astype(compute_dtype)
    w_cat = jnp.concatenate([weight[:, :, 0, 0], weight[:, :, 0, 1]],
                            axis=1).astype(compute_dtype)        # (c_out, 2*c_in)
    b2 = bias.reshape(c_out, 1).astype(jnp.float32)

    # Generation-aware budgets.
    in_size = jnp.dtype(compute_dtype).itemsize
    out_size = jnp.dtype(out_dtype).itemsize
    vmem_cap = _vmem_capacity_bytes()
    if vmem_cap >= 128 * 1024 * 1024:               # v5e / v6e
        max_tile_bytes = 8 * 1024 * 1024
        vmem_limit = 64 * 1024 * 1024
    else:                                           # v7x (64 MiB per TensorCore)
        max_tile_bytes = 4 * 1024 * 1024
        vmem_limit = 32 * 1024 * 1024

    # Rough per-lane footprint: double-buffered in/out blocks + in-kernel temps.
    bytes_per_lane = 5 * c_in * in_size + c_out * (3 * out_size + 4)
    th, h_pad = _pick_spatial_tile(n, h, w, bytes_per_lane, max_tile_bytes)

    if h_pad != h:
        x_c = jnp.pad(x_c, ((0, 0), (0, 0), (0, h_pad - h), (0, 0)))

    s = h_pad * w
    ts = th * w
    x_flat = x_c.reshape(n, c_in, s)                # free reshape; spatial stays on lanes
    grid = (n, s // ts)

    out_flat = pl.pallas_call(
        _conv1x2_kernel,
        out_shape=jax.ShapeDtypeStruct((n, c_out, s), out_dtype),
        grid=grid,
        in_specs=[
            pl.BlockSpec((1, c_in, ts), lambda i, j: (i, 0, j)),
            pl.BlockSpec((c_out, 2 * c_in), lambda i, j: (0, 0)),
            pl.BlockSpec((c_out, 1), lambda i, j: (0, 0)),
        ],
        out_specs=pl.BlockSpec((1, c_out, ts), lambda i, j: (i, 0, j)),
        compiler_params=pltpu.CompilerParams(
            dimension_semantics=("parallel", "parallel"),
            vmem_limit_bytes=vmem_limit,
        ),
    )(x_flat, w_cat, b2)

    # Drop per-row invalid columns {W-2, W-1} (and any padded rows), restore NCHW.
    # TODO(synk): fuse this crop into the consumer in a full model (see header note).
    out = out_flat.reshape(n, c_out, h_pad, w)[:, :, :h, :w_out]
    return out


if __name__ == "__main__":
    key = jax.random.PRNGKey(0)
    k_x, k_w, k_b = jax.random.split(key, 3)

    N, C_IN, H, W = 2, 4, 16, 16
    C_OUT = 8

    x = jax.random.normal(k_x, (N, C_IN, H, W), dtype=jnp.float32)
    # Deterministic parameter init (uniform, matching Conv2d fan-in scaling).
    fan_in = C_IN * 1 * 2
    bound = 1.0 / (fan_in ** 0.5)
    weight = jax.random.uniform(k_w, (C_OUT, C_IN, 1, 2), minval=-bound, maxval=bound,
                                dtype=jnp.float32)
    bias = jax.random.uniform(k_b, (C_OUT,), minval=-bound, maxval=bound,
                              dtype=jnp.float32)

    out = linear_forward(x, weight, bias)
    out = jax.block_until_ready(out)
    assert out.shape == (N, C_OUT, H, W - 2), out.shape

    # Reference computed on the same bf16-rounded inputs the kernel consumes (the dot
    # itself accumulates in f32 on the MXU), so the comparison is tight.
    xq = x.astype(jnp.bfloat16).astype(jnp.float32)
    wq = weight.astype(jnp.bfloat16).astype(jnp.float32)
    ref = jax.lax.conv_general_dilated(
        xq, wq, window_strides=(1, 1), padding="VALID",
        rhs_dilation=(1, 2),
        dimension_numbers=("NCHW", "OIHW", "NCHW"),
    ) + bias.reshape(1, C_OUT, 1, 1)
    assert jnp.allclose(out, ref, atol=2e-3, rtol=2e-3), \
        float(jnp.max(jnp.abs(out - ref)))

    print("KERNEL_OK")
</pallas_src>

<mosaic_0001>
module attributes {stable_mosaic.version = 11 : i64} {
  func.func @_conv1x2_kernel(%arg0: i32, %arg1: i32, %arg2: memref<1x4x128xbf16, #tpu.memory_space<vmem>>, %arg3: memref<8x8xbf16, #tpu.memory_space<vmem>>, %arg4: memref<8x1xf32, #tpu.memory_space<vmem>>, %arg5: memref<1x8x128xf32, #tpu.memory_space<vmem>>) attributes {dimension_semantics = [#tpu.dimension_semantics<parallel>, #tpu.dimension_semantics<parallel>], iteration_bounds = array<i64: 2, 2>, scalar_prefetch = 0 : i64, scratch_operands = 0 : i64, tpu.core_type = #tpu.core_type<tc>, window_params = [{transform_indices = @transform_0, window_bounds = array<i64: 1, 4, 128>}, {pipeline_mode = #tpu.pipeline_mode<synchronous>, transform_indices = @transform_1, window_bounds = array<i64: 8, 8>}, {pipeline_mode = #tpu.pipeline_mode<synchronous>, transform_indices = @transform_2, window_bounds = array<i64: 8, 1>}, {transform_indices = @transform_3, window_bounds = array<i64: 1, 8, 128>}]} {
    %c0 = arith.constant 0 : index
    %c0_0 = arith.constant 0 : index
    %c0_1 = arith.constant 0 : index
    %0 = vector.load %arg2[%c0, %c0_0, %c0_1] : memref<1x4x128xbf16, #tpu.memory_space<vmem>>, vector<1x4x128xbf16>
    %1 = vector.shape_cast %0 : vector<1x4x128xbf16> to vector<4x128xbf16>
    %2 = vector.extract_strided_slice %1 {offsets = [0, 2], sizes = [4, 126], strides = [1, 1]} : vector<4x128xbf16> to vector<4x126xbf16>
    %3 = vector.extract_strided_slice %1 {offsets = [0, 0], sizes = [4, 2], strides = [1, 1]} : vector<4x128xbf16> to vector<4x2xbf16>
    %4 = tpu.concatenate %2, %3 in 1 : vector<4x126xbf16>, vector<4x2xbf16> -> vector<4x128xbf16>
    %5 = tpu.concatenate %1, %4 in 0 : vector<4x128xbf16>, vector<4x128xbf16> -> vector<8x128xbf16>
    %c0_2 = arith.constant 0 : index
    %c0_3 = arith.constant 0 : index
    %6 = vector.load %arg3[%c0_2, %c0_3] : memref<8x8xbf16, #tpu.memory_space<vmem>>, vector<8x8xbf16>
    %cst = arith.constant dense<0.000000e+00> : vector<8x128xf32>
    %7 = tpu.matmul %6, %5, %cst {dimension_numbers = #tpu.dot_dimension_numbers<[1], [0], [0], [1], [0, 0, 1, 1], [], []>} : vector<8x8xbf16>, vector<8x128xbf16>, vector<8x128xf32> -> vector<8x128xf32>
    %c0_4 = arith.constant 0 : index
    %c0_5 = arith.constant 0 : index
    %8 = vector.load %arg4[%c0_4, %c0_5] : memref<8x1xf32, #tpu.memory_space<vmem>>, vector<8x1xf32>
    %9 = vector.broadcast %8 : vector<8x1xf32> to vector<8x128xf32>
    %10 = arith.addf %7, %9 : vector<8x128xf32>
    %c0_6 = arith.constant 0 : index
    %c0_7 = arith.constant 0 : index
    %c0_8 = arith.constant 0 : index
    %11 = vector.load %arg5[%c0_6, %c0_7, %c0_8] : memref<1x8x128xf32, #tpu.memory_space<vmem>>, vector<1x8x128xf32>
    %12 = vector.shape_cast %11 : vector<1x8x128xf32> to vector<8x128xf32>
    %13 = vector.shape_cast %10 : vector<8x128xf32> to vector<1x8x128xf32>
    tpu.vector_store %arg5[%c0_6, %c0_7, %c0_8], %13 {strides = array<i32>} : memref<1x8x128xf32, #tpu.memory_space<vmem>>, vector<1x8x128xf32>,
    return
  }
  func.func @transform_0(%arg0: i32, %arg1: i32) -> (i32, i32, i32) {
    %c0_i32 = arith.constant 0 : i32
    %c0_i32_0 = arith.constant 0 : i32
    return %arg0, %c0_i32, %arg1 : i32, i32, i32
  }
  func.func @transform_1(%arg0: i32, %arg1: i32) -> (i32, i32) {
    %c0_i32 = arith.constant 0 : i32
    %c0_i32_0 = arith.constant 0 : i32
    %c0_i32_1 = arith.constant 0 : i32
    return %c0_i32, %c0_i32_0 : i32, i32
  }
  func.func @transform_2(%arg0: i32, %arg1: i32) -> (i32, i32) {
    %c0_i32 = arith.constant 0 : i32
    %c0_i32_0 = arith.constant 0 : i32
    %c0_i32_1 = arith.constant 0 : i32
    return %c0_i32, %c0_i32_0 : i32, i32
  }
  func.func @transform_3(%arg0: i32, %arg1: i32) -> (i32, i32, i32) {
    %c0_i32 = arith.constant 0 : i32
    %c0_i32_0 = arith.constant 0 : i32
    return %arg0, %c0_i32, %arg1 : i32, i32, i32
  }
}

</mosaic_0001>

<bundles_post_ra>
// kernel: tpu_custom_call.1
= control target key start
LH: loop header
LB: loop body
LE: loop exit
PB: predicated region body
PF: predicated region fallthrough
CT: control target
= control target key end

     0   :  { %8 = vsyncpa [#allocation3], 0  ;;  %s810_s0 = inlined_call_operand.vmem [shape: bf16[2,4,256], index: 0, kind: input, shape index: {}]   ;;  %s811_s1 = inlined_call_operand.hbm [shape: bf16[8,8], index: 1, kind: input, shape index: {}]   ;;  %s812_s2 = inlined_call_operand.vmem [shape: f32[8,1], index: 2, kind: input, shape index: {}]   ;;  %s813_s3 = inlined_call_operand.hbm [shape: f32[2,8,256], index: 3, kind: output, shape index: {}]  }
   0x1   :  { %9 = vsyncpa [#allocation4], 0 }
   0x2   :  { %11 = vsyncpa [#allocation4 + $0x1], 0  ;;  %s650_s12 = smov 0   ;;  %s652_s13 = smov 0  }
   0x3   :  { %s654_s14 = smov 0   ;;  %s656_s15 = smov 0  }
   0x4   :  { %s658_s16 = smov 0   ;;  %s660_s17 = smov 0  }
   0x5   :  { %s662_s18 = smov 0   ;;  %s664_s19 = smov 0  }
   0x6 LB: > { %s387_s20 = sadd.s32 4294967295, %s621_s19   ;;  %s388_s21 = sadd.s32 4294967294, %s621_s19   ;;  %s621_s19 = sphi %s664_s19, %s17_s19   ;;  %s617_s18 = sphi %s662_s18, %s825_s18   ;;  %s613_s17 = sphi %s660_s17, %s824_s17   ;;  %s609_s16 = sphi %s658_s16, %s823_s16   ;;  %s605_s15 = sphi %s656_s15, %s822_s15   ;;  %s601_s14 = sphi %s654_s14, %s821_s14   ;;  %s597_s13 = sphi %s652_s13, %s820_s13   ;;  %s593_s12 = sphi %s650_s12, %s819_s12  }
   0x7   : > { %s26_s22 = sadd.s32 1, %s613_s17  ;;  %s29_s23 = sadd.s32 1, %s617_s18 }
   0x8   : > { %p27_p0 = scmp.ge.s32.totalorder %s26_s22, 2  ;;  %s108_s24 = sadd.s32 1, %s601_s14 }
   0x9   : > { %p118_p1 = scmp.ne.s32.totalorder %s601_s14, %s597_s13  ;;  %p119_p2 = scmp.eq.s32.totalorder %s387_s20, 3 }
   0xa   : > { %s827_s22 = smov (%p27_p0, %s26_s22), 0  ;;  %s829_s23 = smov (!%p27_p0, %s29_s23), %s617_s18 }
   0xb   : > { %s104_s25 = ssub.s32 %s613_s17, %s827_s22  ;;  %p702_p3 = por %p119_p2, %p118_p1 }
   0xc   : > { %p31_p4 = scmp.ge.s32.totalorder %s829_s23, 2  ;;  %p124_p5 = scmp.ne.s32.totalorder %s597_s13, %s593_s12 }
   0xd   : > { %p125_p6 = scmp.eq.s32.totalorder %s388_s21, 3  ;;  %p389_p7 = scmp.ge.s32.totalorder %s621_s19, 1 }
   0xe   : > { %s831_s23 = smov (%p31_p4, %s829_s23), 0  ;;  %p132_p9 = scmp.lt.s32.totalorder %s621_s19, 5 }
   0xf   : > { %p711_p8 = por %p125_p6, %p124_p5  ;;  %s103_s28 = ssub.s32 %s617_s18, %s831_s23 }
  0x10   : > { %s105_s29 = sor.u32 %s104_s25, %s103_s28  ;;  %p718_p10 = pnand %p389_p7, %p132_p9 }
  0x11   : > { %s815_s27 = scalar_select %p711_p8, 1, 0 }
  0x12   : > { %p106_p11 = scmp.eq.s32.totalorder %s105_s29, 0  ;;  %p722_p12 = scmp.eq.s32.totalorder %s387_s20, 0 }
  0x13   : > { %p417_p13 = pneg %p718_p10  ;;  %s623_s6 = smov [#allocation2]  }
  0x14   : > { %s729_s5 = scalar_select %p106_p11, %s601_s14, %s108_s24  }
  0x15   : > { %s145_s7 = sshll.u32 %s623_s6, 4  ;;  %p418_p0 = pnand %p722_p12, %p417_p13  ;;  %s146_s7 = int_to_ptr.vmem [resolvable:$true] %s145_s7 }
  0x16   : > { %s510_s8 = scalar_lea.vmem %s146_s7, 64  ;;  %p518_p6 = scmp.lt.s32.totalorder %s146_s7, %s146_s7 }
  0x17   : > { %p501_p1 = pneg %p418_p0  ;;  %p511_p2 = scmp.ne.s32.totalorder %s146_s7, %s510_s8 }
  0x18   : > { %p519_p7 = scmp.lt.s32.totalorder %s510_s8, %s510_s8 }
  0x19   : > { %p513_p4 = pnand %p511_p2, %p501_p1 }
  0x1a   : > { %p520_p9 = por %p519_p7, %p518_p6 }
  0x1b   : > { %p514_p5 = pneg %p513_p4 }
  0x1d   : > { %p521_p8 = pnand %p520_p9, %p514_p5 }
  0x1f   : > { %524 = shalt.err (!%p521_p8)
}
  0x20   : > { %420 = dma.hbm_to_vmem [thread:$0]  (!%p418_p0), %s811_s1, 64, %s146_s7, [#allocation3]  }
  0x21   : > { %172 = sbr.rel (%p718_p10) target bundleno = 381 (0x17d), region = 32 }
  0x26   : > { %584 = dma.done.wait (%p722_p12), [#allocation3], 64  }
  0x27   : > { %586 = vsyncadd (%p722_p12), [#allocation3], 4294967232  ;;  %p199_p11 = scmp.lt.s32.totalorder %s609_s16, 1  ;;  %p201_p13 = scmp.lt.s32.totalorder %s605_s15, 1  ;;  %v213_v0 = vlaneseq  ;;  %v624_v1 = vmov 1983009808  }
  0x28   : > { %v211_v2 = vunpack.c.l.s4 %v624_v1  ;;  %v625_v4 = vmov 0.0   ;;  %vm626_vm0 = vmmov 0   ;;  %v627_v7 = vmov 0   ;;  %s628_s4 = smov 126   ;;  %v227_v10 = vld [vmem:[%s812_s2] sm:$0xff]  ;;  %s196_s8 = sand.u32 1, %s597_s13  }
  0x29   : > { %s200_s11 = scalar_select %p199_p11, %s609_s16, 1  ;;  %v214_v3 = vshrl.u32 %v213_v0, 7  ;;  %405 = vmatprep.subr.bf16.mxu0 %v625_v4  ;;  %407 = vmatprep.mubr.msk.bf16.mxu0 %vm626_vm0, %v625_v4  ;;  %vm222_vm1 = vcmask 1041408   ;;  %vm237_vm2 = vcmask 1043456   ;;  %v226_v15 = vld [vmem:[#allocation2] sm:$0xf] }
  0x2a   : > { %s202_s20 = scalar_select %p201_p13, %s605_s15, 1  ;;  %v212_v5 = vunpack.c.0.s8 %v211_v2  ;;  %498 = vset.pattern.permute.xlu0 %v627_v7  ;;  %vm233_vm3 = vcmask 64512  }
  0x2b   : > { %s395_s21 = sshll.u32 %s200_s11, 1  ;;  %s394_s9 = sshll.u32 %s196_s8, 3 }
  0x2c   : > { %s204_s24 = sadd.s32 %s395_s21, %s202_s20  ;;  %v215_v6 = vsub.s32 %v212_v5, %v214_v3  ;;  %s399_s10 = sshll.u32 %s609_s16, 1 }
  0x2d   : > { %s396_s25 = sshll.u32 %s204_s24, 1  ;;  %s293_s11 = sadd.s32 %s605_s15, %s399_s10 }
  0x2e   : > { %s206_s30 = scalar_lea.vmem %s810_s0, %s396_s25  ;;  %s400_s20 = sshll.u32 %s293_s11, 7 }
  0x2f   : > { %v208_v8 = vld [vmem:[%s206_s30] sm:$0x3]  ;;  %s198_s21 = scalar_lea.vmem [#allocation5], %s394_s9  ;;  %s758_s29 = scalar_lea.hbm %s813_s3, %s400_s20 }
  0x30   : > { %v216_v9 = vrot.slane %v208_v8, %v215_v6  ;;  %s297_s24 = sshll.u32 %s198_s21, 4  ;;  %s282_s15 = scalar_lea.sflag [#allocation4], %s196_s8  ;;  %s760_s24 = int_to_ptr.vmem [resolvable:$true] %s297_s24 }
  0x31   : > { %s525_s16 = scalar_lea.vmem %s760_s24, 128  ;;  %s629_s30 = smov [#allocation5]  }
  0x32   : > { %217 = vrot.lane.b32.xlu0 %v216_v9, %s628_s4  ;;  %p526_p8 = scmp.ne.s32.totalorder %s760_s24, %s525_s16  ;;  %s529_s4 = sshll.u32 %s629_s30, 4  ;;  %s530_s4 = int_to_ptr.vmem [resolvable:$false] %s529_s4 }
  0x33   : > { %s531_s6 = scalar_lea.vmem %s530_s4, 256  ;;  %p532_p0 = scmp.lt.s32.totalorder %s760_s24, %s530_s4 }
  0x34   : > { %p527_p10 = pnand %p526_p8, %p702_p3  ;;  %p533_p1 = scmp.lt.s32.totalorder %s531_s6, %s525_s16 }
  0x36   : > { %230 = vperm.xlu0 %498, %v227_v10   ;;  %p528_p12 = pneg %p527_p10  ;;  %p534_p2 = por %p533_p1, %p532_p0 }
  0x38   : > { %p535_p4 = pnand %p534_p2, %p528_p12 }
  0xa4   : > { %v218_v11 = vpop.permute.xlu0 %217 }
  0xa5   : > { %v221_v12 = vrot.slane %v218_v11, 6 }
  0xa7   : > { %v225_v13 = vsel %vm222_vm1, %v208_v8, %v221_v12 }
  0xa8   : > { %v238_v14 = vsel %vm237_vm2, %v225_v13, 0 }
  0xa9   : > { %406 = vmatpush3.bf16.msra.mxu0 %v238_v14 }
  0xac   : > { %408 = vmatmul.mubr.msk.bf16.vlgmr.msra.gmra.mxu0 %vm233_vm3, %v226_v15 }
  0xb1   : > { %v231_v16 = vpop.permute.xlu0 %230 }
 0x16c   : > { %v274_v17 = vpop.f32.mrf.mxu0 }
 0x16d   : > { %v275_v18 = vadd.f32 %v274_v17, %v231_v16 }
 0x16e   : > { %v409_v19 = vpop.f32.mrf.mxu0 }
 0x16f   : > { %280 = vst [vmem:[%s198_s21] sm:$0xff] %v275_v18 }
 0x170   : > { %v277_v20 = vpop.f32.mrf.mxu0 }
 0x171   : > { %538 = shalt.err (!%p535_p4)
}
 0x172   : > { %s539_s7 = scalar_lea.hbm %s758_s29, 128  ;;  %s543_s10 = scalar_lea.hbm %s813_s3, 512 }
 0x173   : > { %p540_p5 = scmp.ne.s32.totalorder %s758_s29, %s539_s7  ;;  %p544_p9 = scmp.lt.s32.totalorder %s758_s29, %s813_s3 }
 0x174   : > { %p545_p11 = scmp.lt.s32.totalorder %s543_s10, %s539_s7 }
 0x175   : > { %p541_p6 = pnand %p540_p5, %p702_p3 }
 0x176   : > { %p546_p13 = por %p545_p11, %p544_p9 }
 0x177   : > { %p542_p7 = pneg %p541_p6 }
 0x179   : > { %p547_p8 = pnand %p546_p13, %p542_p7 }
 0x17b   : > { %550 = shalt.err (!%p547_p8)
}
 0x17c   : > { %415 = dma.vmem_to_hbm [thread:$0]  (%p702_p3), %s760_s24, 128, %s758_s29, %s282_s15   ;;  %v410_v21 = vpop.f32.mrf.mxu0 }
 0x17d PF: > { %p427_p10 = scmp.ge.s32.totalorder %s621_s19, 2  ;;  %s309_s21 = sand.u32 1, %s593_s12  }
 0x17e   : > { %p818_p12 = scmp.ne.s32.totalorder %s815_s27, 0  ;;  %s310_s25 = scalar_lea.sflag [#allocation4], %s309_s21 }
 0x180   : > { %p422_p0 = pnand %p427_p10, %p818_p12 }
 0x182   : > { %p423_p1 = pneg %p422_p0 }
 0x184   : > { %588 = dma.done.wait (%p423_p1), %s310_s25, 128  }
 0x185   : > { %590 = vsyncadd (%p423_p1), %s310_s25, 4294967168  ;;  %s17_s19 = sadd.s32 1, %s621_s19   ;;  %s819_s12 = smov %s597_s13 }
 0x186   : > { %p14_p2 = scmp.ge.s32.totalorder %s17_s19, 6   ;;  %s820_s13 = smov %s601_s14 }
 0x187   : > { %s821_s14 = smov %s729_s5  ;;  %s822_s15 = smov %s613_s17 }
 0x188   : > { %s823_s16 = smov %s617_s18  ;;  %s824_s17 = smov %s827_s22 }
 0x189   : > { %s825_s18 = smov %s831_s23  ;;  %16 = sbr.rel (!%p14_p2) target bundleno = 6 (0x6), region = 72 }
 0x18e   :  { %315 = vsyncpa [#allocation3], 1 }
 0x18f   :  { %317 = vsyncpa [#allocation3 + $0x1], 1 }
 0x190   :  { %318 = vsyncpa [#allocation4], 1 }
 0x191   :  { %320 = vsyncpa [#allocation4 + $0x1], 1 }

</bundles_post_ra>
